<compile_context>
chip_gen: v5e
topology: v5e:2x2
jax: 0.10.0
libtpu: 0.0.40
codegen_flags: <defaults>
</compile_context>

<pallas_src>
import functools

import jax
import jax.numpy as jnp
import numpy as np
from jax.experimental import pallas as pl
from jax.experimental.pallas import tpu as pltpu

_LANES = 128


def _round_up(a: int, b: int) -> int:
    return (a + b - 1) // b * b


def _vmem_capacity_bytes() -> int:
    """Physical VMEM of the current generation; conservative fallback (v7x)."""
    try:
        info = pltpu.get_tpu_info()
        cap = int(getattr(info, "vmem_capacity_bytes", 0) or 0)
        if cap > 0:
            return cap
    except Exception:
        pass
    return 64 << 20


def _make_kernel(hw: int, tile: int, n_steps: int, nb: int, needs_mask: bool):
    inv_hw = 1.0 / float(hw)
    n_sub = tile // _LANES
    valid_in_last = hw - (n_steps - 1) * tile  # valid lanes in the final tile

    def kernel(x_ref, w1_ref, w2_ref, o_ref, sum_acc, max_acc):
        # x_ref : (nb, C, tile)   input tile (HW axis possibly zero-padded)
        # w1_ref: (hidden, C)     fc1 (1x1 conv) weight, (out, in)
        # w2_ref: (C, hidden)     fc2 (1x1 conv) weight, (out, in)
        # o_ref : (nb, C, 1)      sigmoid(channel attention)
        # sum_acc: (nb, C, 128) f32 running (lane-folded) sum
        # max_acc: (nb, C, 128) running (lane-folded) max, input dtype
        j = pl.program_id(1)

        @pl.when(j == 0)
        def _init():
            sum_acc[...] = jnp.zeros(sum_acc.shape, sum_acc.dtype)
            max_acc[...] = jnp.full(max_acc.shape, -jnp.inf, dtype=max_acc.dtype)

        def accumulate(masked: bool):
            # Fold the (nb, C, tile) tile down to 128 lanes with pure VPU
            # adds/maxes over 128-lane chunks loaded directly from the ref,
            # then do ONE read-modify-write of the slim scratch accumulators.
            s_run = None
            m_run = None
            for k in range(n_sub):
                if masked:
                    v = min(max(valid_in_last - k * _LANES, 0), _LANES)
                    if v == 0:
                        continue  # chunk is pure zero-padding: skip entirely
                else:
                    v = _LANES
                c = x_ref[:, :, pl.ds(k * _LANES, _LANES)]      # (nb, C, 128)
                cf = c.astype(jnp.float32)
                s_run = cf if s_run is None else s_run + cf
                if v < _LANES:
                    lane = jax.lax.broadcasted_iota(jnp.int32, c.shape, 2)
                    c = jnp.where(lane < v, c, jnp.asarray(-jnp.inf, dtype=c.dtype))
                m_run = c if m_run is None else jnp.maximum(m_run, c)
            sum_acc[...] = sum_acc[...] + s_run
            max_acc[...] = jnp.maximum(max_acc[...], m_run)

        if needs_mask and n_steps > 1:
            @pl.when(j < n_steps - 1)
            def _acc_body():
                accumulate(False)

            @pl.when(j == n_steps - 1)
            def _acc_last():
                accumulate(True)
        elif needs_mask:
            accumulate(True)
        else:
            accumulate(False)

        @pl.when(j == n_steps - 1)
        def _finalize():
            avg = jnp.sum(sum_acc[...], axis=-1, keepdims=True) * inv_hw       # (nb, C, 1)
            mx = jnp.max(max_acc[...].astype(jnp.float32), axis=-1, keepdims=True)
            for b in range(nb):  # nb is small; static unroll
                pooled = jnp.concatenate([avg[b], mx[b]], axis=-1)             # (C, 2)
                # Shared MLP applied to both pooled vectors with one pair of
                # matmuls; weights kept in natural (out, in) layout.
                h = jnp.dot(w1_ref[...], pooled,
                            preferred_element_type=jnp.float32)                # (hidden, 2)
                h = jnp.maximum(h, 0.0)
                y = jnp.dot(w2_ref[...], h,
                            preferred_element_type=jnp.float32)                # (C, 2)
                y = jax.nn.sigmoid(y[:, 0:1] + y[:, 1:2])                      # (C, 1)
                o_ref[b] = y.astype(o_ref.dtype)

    return kernel


@functools.partial(jax.jit, static_argnames=("max_tile_hw", "max_batch_block"))
def channel_attention(x, w1, w2, *, max_tile_hw: int = 8192, max_batch_block: int = 8):
    """ChannelAttention forward.

    x : (N, C, H, W)
    w1: (C // 16, C)   fc1 weight (1x1 conv flattened to (out, in)), bias-free
    w2: (C, C // 16)   fc2 weight (out, in), bias-free
    returns (N, C, 1, 1) in x.dtype
    """
    N, C, H, W = x.shape
    hidden = w1.shape[0]
    assert w1.shape == (hidden, C) and w2.shape == (C, hidden)
    assert jnp.issubdtype(x.dtype, jnp.floating)

    hw = H * W
    itemsize = jnp.dtype(x.dtype).itemsize
    max_dtype = x.dtype if x.dtype == jnp.bfloat16 else jnp.float32

    # Generation-aware VMEM budget (v5e/v6e: 128 MiB, v7x: 64 MiB physical).
    cap = _vmem_capacity_bytes()
    budget = cap // 2  # keep half as headroom for the compiler / other buffers

    # Lane-dense spatial tile: as large as useful, multiple of 128.
    tile = min(_round_up(hw, _LANES), _round_up(max(max_tile_hw, _LANES), _LANES))
    while tile > _LANES and 2 * C * tile * itemsize > budget:
        tile = _round_up(max(tile // 2, _LANES), _LANES)

    # Batch blocking: grow the per-step block toward ~1 MiB when C*tile is small.
    def _fits(nb_: int) -> bool:
        return (2 * nb_ * C * tile * itemsize
                + nb_ * C * _LANES * (4 + itemsize)) <= budget

    nb = 1
    block_bytes = C * tile * itemsize
    if block_bytes < (1 << 20):
        target = min(N, max_batch_block, max(1, (1 << 20) // max(block_bytes, 1)))
        for d in range(target, 0, -1):
            if N % d == 0 and _fits(d):
                nb = d
                break

    n_steps = pl.cdiv(hw, tile)
    hw_pad = n_steps * tile
    needs_mask = hw_pad != hw

    x_flat = x.reshape(N, C, hw)
    if needs_mask:
        # Zero padding: neutral for sum; masked to -inf in-kernel (last step
        # only, partially-valid chunk only) for max.
        x_flat = jnp.pad(x_flat, ((0, 0), (0, 0), (0, hw_pad - hw)))

    # Declared VMEM limit from the real buffer footprint + headroom.
    use = (2 * nb * C * tile * itemsize                  # double-buffered input
           + nb * C * _LANES * (4 + itemsize)            # slim accumulators
           + 4 * C * hidden * 4                          # resident weights
           + 2 * nb * C * 4)                             # output block
    vmem_limit = int(min(max(int(use * 1.5) + (2 << 20), 16 << 20), cap - (8 << 20)))

    kernel = _make_kernel(hw, tile, n_steps, nb, needs_mask)

    # TODO(synk): for N == 1 on v7x (2 TensorCores), split the HW reduction
    # across cores with per-core partial pools + a tiny cross-core combine.
    out = pl.pallas_call(
        kernel,
        out_shape=jax.ShapeDtypeStruct((N, C, 1), jnp.float32),
        grid_spec=pltpu.PrefetchScalarGridSpec(
            num_scalar_prefetch=0,
            grid=(N // nb, n_steps),              # reduction (HW) axis last
            in_specs=[
                pl.BlockSpec((nb, C, tile), lambda i, j: (i, 0, j)),
                # Weights: constant block index -> fetched once, stay resident.
                pl.BlockSpec((hidden, C), lambda i, j: (0, 0)),
                pl.BlockSpec((C, hidden), lambda i, j: (0, 0)),
            ],
            out_specs=pl.BlockSpec((nb, C, 1), lambda i, j: (i, 0, 0)),
            scratch_shapes=[
                pltpu.VMEM((nb, C, _LANES), jnp.float32),   # running folded sum
                pltpu.VMEM((nb, C, _LANES), max_dtype),     # running folded max
            ],
        ),
        compiler_params=pltpu.CompilerParams(
            dimension_semantics=("parallel", "arbitrary"),
            vmem_limit_bytes=vmem_limit,
        ),
    )(x_flat, w1, w2)

    return out.reshape(N, C, 1, 1).astype(x.dtype)


def channel_attention_ref(x, w1, w2):
    """Pure-JAX reference mirroring the PyTorch forward."""
    avg = jnp.mean(x, axis=(2, 3))
    mx = jnp.max(x, axis=(2, 3))

    def mlp(v):
        return jnp.maximum(v @ w1.T, 0.0) @ w2.T

    return jax.nn.sigmoid(mlp(avg) + mlp(mx))[:, :, None, None]


if __name__ == "__main__":
    # The module hardcodes hidden = in_plane // 16, so use C = 32 -> hidden = 2.
    N, C = 2, 32
    hidden = C // 16

    key = jax.random.PRNGKey(0)
    kx, k1, k2 = jax.random.split(key, 3)

    w1 = jax.random.normal(k1, (hidden, C), dtype=jnp.float32) / np.sqrt(C)
    w2 = jax.random.normal(k2, (C, hidden), dtype=jnp.float32) / np.sqrt(hidden)

    # Primary small shape, padded-tail mask path, and multi-step streamed path.
    shapes = [(N, C, 16, 16), (N, C, 10, 10), (N, C, 100, 100)]
    for idx, shape in enumerate(shapes):
        x = jax.random.normal(jax.random.fold_in(kx, idx), shape, dtype=jnp.float32)
        out = jax.block_until_ready(channel_attention(x, w1, w2))
        ref = jax.block_until_ready(channel_attention_ref(x, w1, w2))
        assert out.shape == (shape[0], shape[1], 1, 1), out.shape
        np.testing.assert_allclose(np.asarray(out), np.asarray(ref),
                                   atol=1e-5, rtol=1e-5)

    # bf16 input exercises the reduced-precision max-pool path + mask.
    xb = jax.random.normal(jax.random.fold_in(kx, 99), (N, C, 33, 33),
                           dtype=jnp.float32).astype(jnp.bfloat16)
    outb = jax.block_until_ready(channel_attention(xb, w1, w2))
    refb = channel_attention_ref(xb.astype(jnp.float32), w1, w2)
    np.testing.assert_allclose(np.asarray(outb.astype(jnp.float32)),
                               np.asarray(refb), atol=1e-2, rtol=1e-2)

    print("KERNEL_OK")
</pallas_src>

<mosaic_0001>
module attributes {stable_mosaic.version = 11 : i64} {
  func.func @kernel(%arg0: i32, %arg1: i32, %arg2: memref<2x32x256xf32, #tpu.memory_space<vmem>>, %arg3: memref<2x32xf32, #tpu.memory_space<vmem>>, %arg4: memref<32x2xf32, #tpu.memory_space<vmem>>, %arg5: memref<2x32x1xf32, #tpu.memory_space<vmem>>, %arg6: memref<2x32x128xf32, #tpu.memory_space<vmem>>, %arg7: memref<2x32x128xf32, #tpu.memory_space<vmem>>) attributes {dimension_semantics = [#tpu.dimension_semantics<parallel>, #tpu.dimension_semantics<arbitrary>], iteration_bounds = array<i64: 1, 1>, scalar_prefetch = 0 : i64, scratch_operands = 2 : i64, tpu.core_type = #tpu.core_type<tc>, window_params = [{transform_indices = @transform_0, window_bounds = array<i64: 2, 32, 256>}, {pipeline_mode = #tpu.pipeline_mode<synchronous>, transform_indices = @transform_1, window_bounds = array<i64: 2, 32>}, {pipeline_mode = #tpu.pipeline_mode<synchronous>, transform_indices = @transform_2, window_bounds = array<i64: 32, 2>}, {transform_indices = @transform_3, window_bounds = array<i64: 2, 32, 1>}]} {
    %c0_i32 = arith.constant 0 : i32
    %0 = arith.cmpi eq, %arg1, %c0_i32 : i32
    %1 = arith.extui %0 : i1 to i32
    %c0_i32_0 = arith.constant 0 : i32
    %2 = arith.cmpi ne, %1, %c0_i32_0 : i32
    scf.if %2 {
      %cst = arith.constant 0.000000e+00 : f32
      %16 = vector.broadcast %cst : f32 to vector<2x32x128xf32>
      %c0_19 = arith.constant 0 : index
      %c0_20 = arith.constant 0 : index
      %c0_21 = arith.constant 0 : index
      %17 = vector.load %arg6[%c0_19, %c0_20, %c0_21] : memref<2x32x128xf32, #tpu.memory_space<vmem>>, vector<2x32x128xf32>
      tpu.vector_store %arg6[%c0_19, %c0_20, %c0_21], %16 {strides = array<i32>} : memref<2x32x128xf32, #tpu.memory_space<vmem>>, vector<2x32x128xf32>,
      %cst_22 = arith.constant 0xFF800000 : f32
      %18 = vector.broadcast %cst_22 : f32 to vector<2x32x128xf32>
      %c0_23 = arith.constant 0 : index
      %c0_24 = arith.constant 0 : index
      %c0_25 = arith.constant 0 : index
      %19 = vector.load %arg7[%c0_23, %c0_24, %c0_25] : memref<2x32x128xf32, #tpu.memory_space<vmem>>, vector<2x32x128xf32>
      tpu.vector_store %arg7[%c0_23, %c0_24, %c0_25], %18 {strides = array<i32>} : memref<2x32x128xf32, #tpu.memory_space<vmem>>, vector<2x32x128xf32>,
    } else {
    }
    %c0 = arith.constant 0 : index
    %c0_1 = arith.constant 0 : index
    %c0_2 = arith.constant 0 : index
    %3 = vector.load %arg2[%c0, %c0_1, %c0_2] : memref<2x32x256xf32, #tpu.memory_space<vmem>>, vector<2x32x128xf32>
    %c0_3 = arith.constant 0 : index
    %c0_4 = arith.constant 0 : index
    %c128 = arith.constant 128 : index
    %4 = vector.load %arg2[%c0_3, %c0_4, %c128] : memref<2x32x256xf32, #tpu.memory_space<vmem>>, vector<2x32x128xf32>
    %5 = arith.addf %3, %4 : vector<2x32x128xf32>
    %6 = arith.maximumf %3, %4 : vector<2x32x128xf32>
    %c0_5 = arith.constant 0 : index
    %c0_6 = arith.constant 0 : index
    %c0_7 = arith.constant 0 : index
    %7 = vector.load %arg6[%c0_5, %c0_6, %c0_7] : memref<2x32x128xf32, #tpu.memory_space<vmem>>, vector<2x32x128xf32>
    %8 = arith.addf %7, %5 : vector<2x32x128xf32>
    %c0_8 = arith.constant 0 : index
    %c0_9 = arith.constant 0 : index
    %c0_10 = arith.constant 0 : index
    %9 = vector.load %arg6[%c0_8, %c0_9, %c0_10] : memref<2x32x128xf32, #tpu.memory_space<vmem>>, vector<2x32x128xf32>
    tpu.vector_store %arg6[%c0_8, %c0_9, %c0_10], %8 {strides = array<i32>} : memref<2x32x128xf32, #tpu.memory_space<vmem>>, vector<2x32x128xf32>,
    %c0_11 = arith.constant 0 : index
    %c0_12 = arith.constant 0 : index
    %c0_13 = arith.constant 0 : index
    %10 = vector.load %arg7[%c0_11, %c0_12, %c0_13] : memref<2x32x128xf32, #tpu.memory_space<vmem>>, vector<2x32x128xf32>
    %11 = arith.maximumf %10, %6 : vector<2x32x128xf32>
    %c0_14 = arith.constant 0 : index
    %c0_15 = arith.constant 0 : index
    %c0_16 = arith.constant 0 : index
    %12 = vector.load %arg7[%c0_14, %c0_15, %c0_16] : memref<2x32x128xf32, #tpu.memory_space<vmem>>, vector<2x32x128xf32>
    tpu.vector_store %arg7[%c0_14, %c0_15, %c0_16], %11 {strides = array<i32>} : memref<2x32x128xf32, #tpu.memory_space<vmem>>, vector<2x32x128xf32>,
    %c0_i32_17 = arith.constant 0 : i32
    %13 = arith.cmpi eq, %arg1, %c0_i32_17 : i32
    %14 = arith.extui %13 : i1 to i32
    %c0_i32_18 = arith.constant 0 : i32
    %15 = arith.cmpi ne, %14, %c0_i32_18 : i32
    scf.if %15 {
      %c0_19 = arith.constant 0 : index
      %c0_20 = arith.constant 0 : index
      %c0_21 = arith.constant 0 : index
      %16 = vector.load %arg6[%c0_19, %c0_20, %c0_21] : memref<2x32x128xf32, #tpu.memory_space<vmem>>, vector<2x32x128xf32>
      %cst = arith.constant dense<0.000000e+00> : vector<2x32xf32>
      %17 = vector.multi_reduction <add>, %16, %cst [2] : vector<2x32x128xf32> to vector<2x32xf32>
      %18 = vector.shape_cast %17 : vector<2x32xf32> to vector<2x32x1xf32>
      %cst_22 = arith.constant 3.906250e-03 : f32
      %19 = vector.broadcast %cst_22 : f32 to vector<2x32x1xf32>
      %20 = arith.mulf %18, %19 : vector<2x32x1xf32>
      %c0_23 = arith.constant 0 : index
      %c0_24 = arith.constant 0 : index
      %c0_25 = arith.constant 0 : index
      %21 = vector.load %arg7[%c0_23, %c0_24, %c0_25] : memref<2x32x128xf32, #tpu.memory_space<vmem>>, vector<2x32x128xf32>
      %cst_26 = arith.constant dense<0xFF800000> : vector<2x32xf32>
      %22 = vector.multi_reduction <maximumf>, %21, %cst_26 [2] : vector<2x32x128xf32> to vector<2x32xf32>
      %23 = vector.shape_cast %22 : vector<2x32xf32> to vector<2x32x1xf32>
      %24 = vector.extract_strided_slice %20 {offsets = [0, 0, 0], sizes = [1, 32, 1], strides = [1, 1, 1]} : vector<2x32x1xf32> to vector<1x32x1xf32>
      %25 = vector.shape_cast %24 : vector<1x32x1xf32> to vector<32x1xf32>
      %26 = vector.extract_strided_slice %23 {offsets = [0, 0, 0], sizes = [1, 32, 1], strides = [1, 1, 1]} : vector<2x32x1xf32> to vector<1x32x1xf32>
      %27 = vector.shape_cast %26 : vector<1x32x1xf32> to vector<32x1xf32>
      %28 = tpu.concatenate %25, %27 in 1 : vector<32x1xf32>, vector<32x1xf32> -> vector<32x2xf32>
      %c0_27 = arith.constant 0 : index
      %c0_28 = arith.constant 0 : index
      %29 = vector.load %arg3[%c0_27, %c0_28] : memref<2x32xf32, #tpu.memory_space<vmem>>, vector<2x32xf32>
      %cst_29 = arith.constant dense<0.000000e+00> : vector<2x2xf32>
      %30 = tpu.matmul %29, %28, %cst_29 {dimension_numbers = #tpu.dot_dimension_numbers<[1], [0], [0], [1], [0, 0, 1, 1], [], []>} : vector<2x32xf32>, vector<32x2xf32>, vector<2x2xf32> -> vector<2x2xf32>
      %cst_30 = arith.constant 0.000000e+00 : f32
      %31 = vector.broadcast %cst_30 : f32 to vector<2x2xf32>
      %32 = arith.maximumf %30, %31 : vector<2x2xf32>
      %c0_31 = arith.constant 0 : index
      %c0_32 = arith.constant 0 : index
      %33 = vector.load %arg4[%c0_31, %c0_32] : memref<32x2xf32, #tpu.memory_space<vmem>>, vector<32x2xf32>
      %cst_33 = arith.constant dense<0.000000e+00> : vector<32x2xf32>
      %34 = tpu.matmul %33, %32, %cst_33 {dimension_numbers = #tpu.dot_dimension_numbers<[1], [0], [0], [1], [0, 0, 1, 1], [], []>} : vector<32x2xf32>, vector<2x2xf32>, vector<32x2xf32> -> vector<32x2xf32>
      %35 = vector.extract_strided_slice %34 {offsets = [0, 0], sizes = [32, 1], strides = [1, 1]} : vector<32x2xf32> to vector<32x1xf32>
      %36 = vector.extract_strided_slice %34 {offsets = [0, 1], sizes = [32, 1], strides = [1, 1]} : vector<32x2xf32> to vector<32x1xf32>
      %37 = arith.addf %35, %36 : vector<32x1xf32>
      %38 = arith.negf %37 : vector<32x1xf32>
      %39 = math.exp %38 : vector<32x1xf32>
      %cst_34 = arith.constant 1.000000e+00 : f32
      %40 = vector.broadcast %cst_34 : f32 to vector<32x1xf32>
      %41 = arith.addf %40, %39 : vector<32x1xf32>
      %42 = arith.divf %40, %41 : vector<32x1xf32>
      %c0_35 = arith.constant 0 : index
      %c0_36 = arith.constant 0 : index
      %c0_37 = arith.constant 0 : index
      %43 = vector.load %arg5[%c0_35, %c0_36, %c0_37] : memref<2x32x1xf32, #tpu.memory_space<vmem>>, vector<1x32x1xf32>
      %44 = vector.shape_cast %43 : vector<1x32x1xf32> to vector<32x1xf32>
      %45 = vector.shape_cast %42 : vector<32x1xf32> to vector<1x32x1xf32>
      tpu.vector_store %arg5[%c0_35, %c0_36, %c0_37], %45 {strides = array<i32>} : memref<2x32x1xf32, #tpu.memory_space<vmem>>, vector<1x32x1xf32>,
      %46 = vector.extract_strided_slice %20 {offsets = [1, 0, 0], sizes = [1, 32, 1], strides = [1, 1, 1]} : vector<2x32x1xf32> to vector<1x32x1xf32>
      %47 = vector.shape_cast %46 : vector<1x32x1xf32> to vector<32x1xf32>
      %48 = vector.extract_strided_slice %23 {offsets = [1, 0, 0], sizes = [1, 32, 1], strides = [1, 1, 1]} : vector<2x32x1xf32> to vector<1x32x1xf32>
      %49 = vector.shape_cast %48 : vector<1x32x1xf32> to vector<32x1xf32>
      %50 = tpu.concatenate %47, %49 in 1 : vector<32x1xf32>, vector<32x1xf32> -> vector<32x2xf32>
      %c0_38 = arith.constant 0 : index
      %c0_39 = arith.constant 0 : index
      %51 = vector.load %arg3[%c0_38, %c0_39] : memref<2x32xf32, #tpu.memory_space<vmem>>, vector<2x32xf32>
      %cst_40 = arith.constant dense<0.000000e+00> : vector<2x2xf32>
      %52 = tpu.matmul %51, %50, %cst_40 {dimension_numbers = #tpu.dot_dimension_numbers<[1], [0], [0], [1], [0, 0, 1, 1], [], []>} : vector<2x32xf32>, vector<32x2xf32>, vector<2x2xf32> -> vector<2x2xf32>
      %cst_41 = arith.constant 0.000000e+00 : f32
      %53 = vector.broadcast %cst_41 : f32 to vector<2x2xf32>
      %54 = arith.maximumf %52, %53 : vector<2x2xf32>
      %c0_42 = arith.constant 0 : index
      %c0_43 = arith.constant 0 : index
      %55 = vector.load %arg4[%c0_42, %c0_43] : memref<32x2xf32, #tpu.memory_space<vmem>>, vector<32x2xf32>
      %cst_44 = arith.constant dense<0.000000e+00> : vector<32x2xf32>
      %56 = tpu.matmul %55, %54, %cst_44 {dimension_numbers = #tpu.dot_dimension_numbers<[1], [0], [0], [1], [0, 0, 1, 1], [], []>} : vector<32x2xf32>, vector<2x2xf32>, vector<32x2xf32> -> vector<32x2xf32>
      %57 = vector.extract_strided_slice %56 {offsets = [0, 0], sizes = [32, 1], strides = [1, 1]} : vector<32x2xf32> to vector<32x1xf32>
      %58 = vector.extract_strided_slice %56 {offsets = [0, 1], sizes = [32, 1], strides = [1, 1]} : vector<32x2xf32> to vector<32x1xf32>
      %59 = arith.addf %57, %58 : vector<32x1xf32>
      %60 = arith.negf %59 : vector<32x1xf32>
      %61 = math.exp %60 : vector<32x1xf32>
      %cst_45 = arith.constant 1.000000e+00 : f32
      %62 = vector.broadcast %cst_45 : f32 to vector<32x1xf32>
      %63 = arith.addf %62, %61 : vector<32x1xf32>
      %64 = arith.divf %62, %63 : vector<32x1xf32>
      %c1 = arith.constant 1 : index
      %c0_46 = arith.constant 0 : index
      %c0_47 = arith.constant 0 : index
      %65 = vector.load %arg5[%c1, %c0_46, %c0_47] : memref<2x32x1xf32, #tpu.memory_space<vmem>>, vector<1x32x1xf32>
      %66 = vector.shape_cast %65 : vector<1x32x1xf32> to vector<32x1xf32>
      %67 = vector.shape_cast %64 : vector<32x1xf32> to vector<1x32x1xf32>
      tpu.vector_store %arg5[%c1, %c0_46, %c0_47], %67 {strides = array<i32>} : memref<2x32x1xf32, #tpu.memory_space<vmem>>, vector<1x32x1xf32>,
    } else {
    }
    return
  }
  func.func @transform_0(%arg0: i32, %arg1: i32) -> (i32, i32, i32) {
    %c0_i32 = arith.constant 0 : i32
    %c0_i32_0 = arith.constant 0 : i32
    return %arg0, %c0_i32, %arg1 : i32, i32, i32
  }
  func.func @transform_1(%arg0: i32, %arg1: i32) -> (i32, i32) {
    %c0_i32 = arith.constant 0 : i32
    %c0_i32_0 = arith.constant 0 : i32
    %c0_i32_1 = arith.constant 0 : i32
    return %c0_i32, %c0_i32_0 : i32, i32
  }
  func.func @transform_2(%arg0: i32, %arg1: i32) -> (i32, i32) {
    %c0_i32 = arith.constant 0 : i32
    %c0_i32_0 = arith.constant 0 : i32
    %c0_i32_1 = arith.constant 0 : i32
    return %c0_i32, %c0_i32_0 : i32, i32
  }
  func.func @transform_3(%arg0: i32, %arg1: i32) -> (i32, i32, i32) {
    %c0_i32 = arith.constant 0 : i32
    %c0_i32_0 = arith.constant 0 : i32
    %c0_i32_1 = arith.constant 0 : i32
    return %arg0, %c0_i32, %c0_i32_0 : i32, i32, i32
  }
}

</mosaic_0001>

<bundles_post_ra>
// kernel: channel_attention.1
= control target key start
LH: loop header
LB: loop body
LE: loop exit
PB: predicated region body
PF: predicated region fallthrough
CT: control target
= control target key end

     0   :  { %vm173_vm0 = vcmask 7168   ;;  %vm179_vm1 = vcmask 261120   ;;  %vm221_vm2 = vcmask 1041408   ;;  %vm208_vm3 = vcmask 15360   ;;  %s595_s27 = smov 127   ;;  %s754_s0 = inlined_call_operand.vmem [shape: f32[2,32,256], index: 0, kind: input, shape index: {}]   ;;  %s755_s1 = inlined_call_operand.vmem [shape: f32[2,32], index: 1, kind: input, shape index: {}]   ;;  %s756_s2 = inlined_call_operand.vmem [shape: f32[32,2], index: 2, kind: input, shape index: {}]   ;;  %s757_s3 = inlined_call_operand.vmem [shape: f32[2,32,1], index: 3, kind: output, shape index: {}]  }
   0x1   :  { %v41_v0 = vld [vmem:[%s754_s0 + $0x70] sm:$0xff]  ;;  %v49_v1 = vld [vmem:[%s754_s0 + $0x78] sm:$0xff]  ;;  %v40_v2 = vld [vmem:[%s754_s0 + $0x60] sm:$0xff] }
   0x2   :  { %v65_v3 = vmax.f32 %v41_v0, %v49_v1  ;;  %v57_v4 = vadd.f32 %v49_v1, %v41_v0  ;;  %v48_v5 = vld [vmem:[%s754_s0 + $0x68] sm:$0xff]  ;;  %v39_v7 = vld [vmem:[%s754_s0 + $0x50] sm:$0xff]  ;;  %v47_v8 = vld [vmem:[%s754_s0 + $0x58] sm:$0xff] }
   0x3   :  { %v64_v6 = vmax.f32 %v40_v2, %v48_v5  ;;  %v38_v9 = vld [vmem:[%s754_s0 + $0x40] sm:$0xff]  ;;  %v46_v10 = vld [vmem:[%s754_s0 + $0x48] sm:$0xff]  ;;  %v56_v11 = vadd.f32 %v48_v5, %v40_v2  ;;  %v55_v12 = vadd.f32 %v47_v8, %v39_v7  ;;  %v37_v14 = vld [vmem:[%s754_s0 + $0x30] sm:$0xff]  ;;  %v63_v16 = vmax.f32 %v39_v7, %v47_v8 }
   0x4   :  { %171 = vmax.xlane.f32.xlu1 %v65_v3  ;;  %139 = vadd.xlane.f32.xlu0 %v57_v4  ;;  %v54_v13 = vadd.f32 %v46_v10, %v38_v9  ;;  %v45_v15 = vld [vmem:[%s754_s0 + $0x38] sm:$0xff]  ;;  %v62_v17 = vmax.f32 %v38_v9, %v46_v10  ;;  %v36_v19 = vld [vmem:[%s754_s0 + $0x20] sm:$0xff]  ;;  %v44_v20 = vld [vmem:[%s754_s0 + $0x28] sm:$0xff] }
   0x5   :  { %169 = vmax.xlane.f32.xlu2 %v64_v6  ;;  %v53_v18 = vadd.f32 %v45_v15, %v37_v14  ;;  %v35_v21 = vld [vmem:[%s754_s0 + $0x10] sm:$0xff]  ;;  %v43_v22 = vld [vmem:[%s754_s0 + $0x18] sm:$0xff]  ;;  %v61_v23 = vmax.f32 %v37_v14, %v45_v15  ;;  %v52_v24 = vadd.f32 %v44_v20, %v36_v19  ;;  %v34_v26 = vld [vmem:[%s754_s0] sm:$0xff]  ;;  %v60_v28 = vmax.f32 %v36_v19, %v44_v20 }
   0x6   :  { %v51_v25 = vadd.f32 %v43_v22, %v35_v21  ;;  %v42_v27 = vld [vmem:[%s754_s0 + $0x8] sm:$0xff]  ;;  %v59_v30 = vmax.f32 %v35_v21, %v43_v22  ;;  %v358_v48 = vld [vmem:[%s755_s1] sm:$0x3]  ;;  %v385_v6 = vld [vmem:[%s756_s2 + $0x10] sm:$0xff] }
   0x7   :  { %v50_v29 = vadd.f32 %v42_v27, %v34_v26  ;;  %v58_v31 = vmax.f32 %v34_v26, %v42_v27  ;;  %v178_v0 = vld [vmem:[%s755_s1] sm:$0x3]  ;;  %v384_v4 = vld [vmem:[%s756_s2 + $0x8] sm:$0xff]  ;;  %v386_v9 = vld [vmem:[%s756_s2 + $0x18] sm:$0xff] }
   0x8   :  { %v204_v5 = vld [vmem:[%s756_s2] sm:$0xff] }
   0xc   :  { %137 = vadd.xlane.f32.xlu0 %v56_v11  ;;  %135 = vadd.xlane.f32.xlu1 %v55_v12 }
   0xd   :  { %133 = vadd.xlane.f32.xlu2 %v54_v13 }
  0x14   :  { %167 = vmax.xlane.f32.xlu0 %v63_v16  ;;  %165 = vmax.xlane.f32.xlu1 %v62_v17 }
  0x15   :  { %131 = vadd.xlane.f32.xlu2 %v53_v18 }
  0x1c   :  { %163 = vmax.xlane.f32.xlu1 %v61_v23  ;;  %129 = vadd.xlane.f32.xlu0 %v52_v24 }
  0x1d   :  { %127 = vadd.xlane.f32.xlu2 %v51_v25 }
  0x24   :  { %161 = vmax.xlane.f32.xlu0 %v60_v28  ;;  %125 = vadd.xlane.f32.xlu1 %v50_v29 }
  0x25   :  { %159 = vmax.xlane.f32.xlu2 %v59_v30 }
  0x2c   :  { %157 = vmax.xlane.f32.xlu0 %v58_v31 }
  0x77   :  { %v172_v32 = vpop.xlane.xlu1 %171  ;;  %v140_v33 = vpop.xlane.xlu0 %139 }
  0x78   :  { %v148_v34 = vmul.f32 0.00390625, %v140_v33  ;;  %v170_v35 = vpop.xlane.xlu2 %169 }
  0x7a   :  { %v357_v36 = vsel %vm173_vm0, %v148_v34, %v172_v32 }
  0x7b   :  { %374 = vmatpush.msra.mxu2 %v357_v36 }
  0x7f   :  { %v138_v37 = vpop.xlane.xlu0 %137  ;;  %v136_v38 = vpop.xlane.xlu1 %135 }
  0x80   :  { %v147_v39 = vmul.f32 0.00390625, %v138_v37  ;;  %v134_v40 = vpop.xlane.xlu2 %133  ;;  %v146_v42 = vmul.f32 0.00390625, %v136_v38 }
  0x81   :  { %v145_v43 = vmul.f32 0.00390625, %v134_v40 }
  0x82   :  { %v356_v41 = vsel %vm173_vm0, %v147_v39, %v170_v35 }
  0x83   :  { %375 = vmatpush.msra.mxu2 %v356_v41 }
  0x87   :  { %v168_v44 = vpop.xlane.xlu0 %167  ;;  %v166_v45 = vpop.xlane.xlu1 %165 }
  0x88   :  { %v132_v46 = vpop.xlane.xlu2 %131  ;;  %v355_v47 = vsel %vm173_vm0, %v146_v42, %v168_v44  ;;  %v354_v49 = vsel %vm173_vm0, %v145_v43, %v166_v45 }
  0x89   :  { %376 = vmatpush.msra.mxu2 %v355_v47  ;;  %v144_v50 = vmul.f32 0.00390625, %v132_v46 }
  0x8b   :  { %377 = vmatpush.msra.mxu2 %v354_v49 }
  0x8c   :  { %546 = vmatmul.msk.f32.vlgmr.msra.gmra.mxu2 %vm179_vm1, %v358_v48 }
  0x8f   :  { %v164_v51 = vpop.xlane.xlu1 %163  ;;  %v130_v52 = vpop.xlane.xlu0 %129 }
  0x90   :  { %v128_v53 = vpop.xlane.xlu2 %127  ;;  %v177_v54 = vsel %vm173_vm0, %v144_v50, %v164_v51  ;;  %v143_v55 = vmul.f32 0.00390625, %v130_v52 }
  0x91   :  { %195 = vmatpush.msra.mxu0 %v177_v54  ;;  %v142_v56 = vmul.f32 0.00390625, %v128_v53 }
  0x97   :  { %v162_v57 = vpop.xlane.xlu0 %161  ;;  %v126_v60 = vpop.xlane.xlu1 %125 }
  0x98   :  { %v160_v58 = vpop.xlane.xlu2 %159  ;;  %v176_v59 = vsel %vm173_vm0, %v143_v55, %v162_v57  ;;  %v141_v62 = vmul.f32 0.00390625, %v126_v60 }
  0x99   :  { %196 = vmatpush.msra.mxu0 %v176_v59  ;;  %v175_v61 = vsel %vm173_vm0, %v142_v56, %v160_v58 }
  0x9b   :  { %197 = vmatpush.msra.mxu0 %v175_v61 }
  0x9f   :  { %v158_v63 = vpop.xlane.xlu0 %157 }
  0xa0   :  { %v174_v1 = vsel %vm173_vm0, %v141_v62, %v158_v63 }
  0xa1   :  { %198 = vmatpush.msra.mxu0 %v174_v1 }
  0xa2   :  { %536 = vmatmul.msk.f32.vlgmr.msra.gmra.mxu0 %vm179_vm1, %v178_v0 }
 0x10f   :  { %v379_v2 = vpop.f32.mrf.mxu2 }
 0x110   :  { %v382_v3 = vmax.f32 %v379_v2, 0.0 }
 0x112   :  { %561 = vmatpush.msk.msra.mxu3 %vm221_vm2, %v382_v3  ;;  %547 = vmatpush.msk.msrb.mxu2 %vm221_vm2, %v382_v3 }
 0x113   :  { %549 = vmatmul.msk.f32.vlgmr.msra.gmra.mxu3 %vm208_vm3, %v384_v4  ;;  %548 = vmatmul.msk.f32.vlgmr.msrb.gmra.mxu2 %vm208_vm3, %v204_v5 }
 0x11b   :  { %550 = vmatmul.msk.f32.gmra.mxu3 %vm208_vm3, %v385_v6 }
 0x11f   :  { %v200_v7 = vpop.f32.mrf.mxu0 }
 0x120   :  { %v203_v8 = vmax.f32 %v200_v7, 0.0 }
 0x122   :  { %537 = vmatpush.msk.msrb.mxu0 %vm221_vm2, %v203_v8  ;;  %560 = vmatpush.msk.msra.mxu1 %vm221_vm2, %v203_v8 }
 0x123   :  { %538 = vmatmul.msk.f32.vlgmr.msrb.gmra.mxu0 %vm208_vm3, %v204_v5  ;;  %539 = vmatmul.msk.f32.vlgmr.msra.gmra.mxu1 %vm208_vm3, %v384_v4 }
 0x124   :  { %551 = vmatmul.msk.f32.gmra.mxu3 %vm208_vm3, %v386_v9 }
 0x12b   :  { %540 = vmatmul.msk.f32.gmra.mxu1 %vm208_vm3, %v385_v6 }
 0x133   :  { %541 = vmatmul.msk.f32.gmra.mxu1 %vm208_vm3, %v386_v9 }
 0x196   :  { %v700_v10 = vpop.f32.mrf.mxu3  ;;  %v419_v14 = vpop.f32.mrf.mxu2 }
 0x19e   :  { %v425_v13 = vpop.f32.mrf.mxu3 }
 0x1a0   :  { %v242_v11 = vpop.f32.mrf.mxu0  ;;  %v245_v12 = vpop.f32.mrf.mxu1 }
 0x1a1   :  { %260 = vrot.lane.b32.xlu2 %v245_v12, %s595_s27  ;;  %258 = vrot.lane.b32.xlu1 %v242_v11, %s595_s27 }
 0x1a7   :  { %v702_v16 = vpop.f32.mrf.mxu3 }
 0x1a8   :  { %v248_v15 = vpop.f32.mrf.mxu1 }
 0x1a9   :  { %262 = vrot.lane.b32.xlu0 %v248_v15, %s595_s27  ;;  %435 = vrot.lane.b32.xlu1 %v419_v14, %s595_s27 }
 0x1b0   :  { %v251_v17 = vpop.f32.mrf.mxu1 }
 0x1b1   :  { %437 = vrot.lane.b32.xlu0 %v700_v10, %s595_s27  ;;  %264 = vrot.lane.b32.xlu2 %v251_v17, %s595_s27 }
 0x1b2   :  { %441 = vrot.lane.b32.xlu1 %v702_v16, %s595_s27 }
 0x1b9   :  { %439 = vrot.lane.b32.xlu2 %v425_v13, %s595_s27 }
 0x1fb   :  { %v261_v18 = vpop.permute.xlu2 %260 }
 0x1fc   :  { %v271_v19 = vadd.f32 %v261_v18, %v245_v12 }
 0x1fe   :  { %v543_v20 = vmul.f32 -1.442695, %v271_v19 }
 0x200   :  { %563 = vpow2.f32 %v543_v20 }
 0x206   :  { %v564_v21 = vpop.eup %563 }
 0x207   :  { %v287_v22 = vadd.f32 1.0, %v564_v21 }
 0x209   :  { %565 = vrcp.f32 %v287_v22  ;;  %v314_v29 = vand.u32 2147483647, %v287_v22  ;;  %v316_v30 = vand.u32 2147483648, %v287_v22  ;;  %vm310_vm5 = vweird.f32 %v287_v22 }
 0x20b   :  { %v265_v23 = vpop.permute.xlu2 %264  ;;  %v317_v40 = vor.u32 1.1754944e-38, %v316_v30  ;;  %vm315_vm7 = vcmp.eq.f32.partialorder %v314_v29, 8.507059e+37 }
 0x20c   :  { %v273_v24 = vadd.f32 %v265_v23, %v251_v17 }
 0x20e   :  { %v545_v25 = vmul.f32 -1.442695, %v273_v24 }
 0x20f   :  { %v566_v26 = vpop.eup %565 }
 0x210   :  { %v306_v27 = vmul.f32 %v566_v26, %v287_v22  ;;  %567 = vpow2.f32 %v545_v25  ;;  %vm311_vm4 = vweird.f32 %v566_v26 }
 0x211   :  { %vm312_vm6 = vmor %vm310_vm5, %vm311_vm4 }
 0x212   :  { %v307_v28 = vsub.f32 1.0, %v306_v27 }
 0x213   :  { %v440_v31 = vpop.permute.xlu2 %439  ;;  %v259_v32 = vpop.permute.xlu1 %258 }
 0x214   :  { %v308_v33 = vmul.f32 %v566_v26, %v307_v28  ;;  %v449_v34 = vadd.f32 %v440_v31, %v425_v13  ;;  %v270_v35 = vadd.f32 %v259_v32, %v242_v11 }
 0x216   :  { %v568_v36 = vpop.eup %567  ;;  %v309_v37 = vadd.f32 %v566_v26, %v308_v33  ;;  %v554_v38 = vmul.f32 -1.442695, %v449_v34  ;;  %v542_v39 = vmul.f32 -1.442695, %v270_v35 }
 0x217   :  { %v289_v41 = vadd.f32 1.0, %v568_v36 }
 0x218   :  { %v313_v42 = vsel %vm312_vm6, %v566_v26, %v309_v37  ;;  %569 = vpow2.f32 %v554_v38 }
 0x219   :  { %v318_v43 = vsel %vm315_vm7, %v317_v40, %v313_v42  ;;  %571 = vrcp.f32 %v289_v41  ;;  %v346_v57 = vand.u32 2147483648, %v289_v41  ;;  %v344_v60 = vand.u32 2147483647, %v289_v41 }
 0x21a   :  { %351 = vst.msk [vmem:[%s757_s3 + $0x8] sm:$0xff] %vm173_vm0, %v318_v43  ;;  %573 = vpow2.f32 %v542_v39  ;;  %vm340_vm9 = vweird.f32 %v289_v41 }
 0x21b   :  { %v263_v44 = vpop.permute.xlu0 %262  ;;  %v436_v45 = vpop.permute.xlu1 %435  ;;  %v347_v3 = vor.u32 1.1754944e-38, %v346_v57  ;;  %vm345_vm11 = vcmp.eq.f32.partialorder %v344_v60, 8.507059e+37 }
 0x21c   :  { %v272_v46 = vadd.f32 %v263_v44, %v248_v15  ;;  %v447_v47 = vadd.f32 %v436_v45, %v419_v14 }
 0x21e   :  { %v570_v48 = vpop.eup %569  ;;  %v544_v49 = vmul.f32 -1.442695, %v272_v46  ;;  %v552_v50 = vmul.f32 -1.442695, %v447_v47 }
 0x21f   :  { %v572_v51 = vpop.eup %571  ;;  %v465_v52 = vadd.f32 1.0, %v570_v48 }
 0x220   :  { %v574_v53 = vpop.eup %573  ;;  %v336_v54 = vmul.f32 %v572_v51, %v289_v41  ;;  %575 = vpow2.f32 %v544_v49  ;;  %vm341_vm8 = vweird.f32 %v572_v51 }
 0x221   :  { %577 = vrcp.f32 %v465_v52  ;;  %v286_v56 = vadd.f32 1.0, %v574_v53  ;;  %vm342_vm10 = vmor %vm340_vm9, %vm341_vm8  ;;  %v508_v14 = vand.u32 2147483648, %v465_v52  ;;  %v506_v17 = vand.u32 2147483647, %v465_v52 }
 0x222   :  { %v337_v55 = vsub.f32 1.0, %v336_v54  ;;  %579 = vpow2.f32 %v552_v50  ;;  %vm502_vm13 = vweird.f32 %v465_v52 }
 0x223   :  { %v438_v58 = vpop.permute.xlu0 %437  ;;  %581 = vrcp.f32 %v286_v56  ;;  %v299_v20 = vand.u32 2147483647, %v286_v56  ;;  %v301_v21 = vand.u32 2147483648, %v286_v56  ;;  %v509_v23 = vor.u32 1.1754944e-38, %v508_v14 }
 0x224   :  { %v338_v59 = vmul.f32 %v572_v51, %v337_v55  ;;  %v442_v61 = vpop.permute.xlu1 %441  ;;  %v448_v62 = vadd.f32 %v438_v58, %v700_v10  ;;  %vm507_vm1 = vcmp.eq.f32.partialorder %v506_v17, 8.507059e+37  ;;  %vm295_vm2 = vweird.f32 %v286_v56 }
 0x225   :  { %v450_v63 = vadd.f32 %v442_v61, %v702_v16  ;;  %vm300_vm4 = vcmp.eq.f32.partialorder %v299_v20, 8.507059e+37  ;;  %v302_v33 = vor.u32 1.1754944e-38, %v301_v21 }
 0x226   :  { %v576_v0 = vpop.eup %575  ;;  %v339_v1 = vadd.f32 %v572_v51, %v338_v59  ;;  %v553_v5 = vmul.f32 -1.442695, %v448_v62 }
 0x227   :  { %v578_v2 = vpop.eup %577  ;;  %v712_v4 = vadd.f32 1.0, %v576_v0  ;;  %v555_v6 = vmul.f32 -1.442695, %v450_v63 }
 0x228   :  { %v580_v7 = vpop.eup %579  ;;  %v343_v8 = vsel %vm342_vm10, %v572_v51, %v339_v1  ;;  %v498_v9 = vmul.f32 %v578_v2, %v465_v52  ;;  %vm503_vm12 = vweird.f32 %v578_v2 }
 0x229   :  { %v348_v11 = vsel %vm345_vm11, %v347_v3, %v343_v8  ;;  %583 = vrcp.f32 %v712_v4  ;;  %v582_v10 = vpop.eup %581  ;;  %v719_v13 = vadd.f32 1.0, %v580_v7  ;;  %vm504_vm14 = vmor %vm502_vm13, %vm503_vm12  ;;  %v331_v37 = vand.u32 2147483648, %v712_v4 }
 0x22a   :  { %353 = vst.msk [vmem:[%s757_s3 + $0x18] sm:$0xff] %vm173_vm0, %v348_v11  ;;  %v499_v12 = vsub.f32 1.0, %v498_v9  ;;  %585 = vpow2.f32 %v553_v5  ;;  %v291_v15 = vmul.f32 %v582_v10, %v286_v56  ;;  %vm296_vm15 = vweird.f32 %v582_v10 }
 0x22b   :  { %587 = vpow2.f32 %v555_v6  ;;  %vm297_vm3 = vmor %vm295_vm2, %vm296_vm15  ;;  %v329_v41 = vand.u32 2147483647, %v712_v4  ;;  %vm325_vm6 = vweird.f32 %v712_v4  ;;  %v478_v44 = vand.u32 2147483648, %v719_v13 }
 0x22c   :  { %v500_v16 = vmul.f32 %v578_v2, %v499_v12  ;;  %589 = vrcp.f32 %v719_v13  ;;  %v292_v18 = vsub.f32 1.0, %v291_v15  ;;  %v332_v45 = vor.u32 1.1754944e-38, %v331_v37 }
 0x22d   :  { %v476_v47 = vand.u32 2147483647, %v719_v13  ;;  %vm330_vm9 = vcmp.eq.f32.partialorder %v329_v41, 8.507059e+37  ;;  %vm472_vm10 = vweird.f32 %v719_v13  ;;  %v479_v52 = vor.u32 1.1754944e-38, %v478_v44 }
 0x22e   :  { %v501_v19 = vadd.f32 %v578_v2, %v500_v16  ;;  %v293_v24 = vmul.f32 %v582_v10, %v292_v18 }
 0x22f   :  { %v584_v22 = vpop.eup %583  ;;  %vm477_vm12 = vcmp.eq.f32.partialorder %v476_v47, 8.507059e+37 }
 0x230   :  { %v586_v25 = vpop.eup %585  ;;  %v505_v26 = vsel %vm504_vm14, %v578_v2, %v501_v19  ;;  %v321_v27 = vmul.f32 %v584_v22, %v712_v4  ;;  %v294_v30 = vadd.f32 %v582_v10, %v293_v24  ;;  %vm326_vm5 = vweird.f32 %v584_v22 }
 0x231   :  { %v588_v28 = vpop.eup %587  ;;  %v510_v29 = vsel %vm507_vm1, %v509_v23, %v505_v26  ;;  %v464_v31 = vadd.f32 1.0, %v586_v25  ;;  %vm327_vm7 = vmor %vm325_vm6, %vm326_vm5 }
 0x232   :  { %v590_v32 = vpop.eup %589  ;;  %558 = vst.msk [vmem:[%s757_s3 + $0x30] sm:$0xff] %vm173_vm0, %v510_v29  ;;  %v322_v34 = vsub.f32 1.0, %v321_v27  ;;  %v466_v35 = vadd.f32 1.0, %v588_v28  ;;  %v298_v36 = vsel %vm297_vm3, %v582_v10, %v294_v30 }
 0x233   :  { %v468_v38 = vmul.f32 %v590_v32, %v719_v13  ;;  %591 = vrcp.f32 %v464_v31  ;;  %v303_v39 = vsel %vm300_vm4, %v302_v33, %v298_v36  ;;  %vm473_vm8 = vweird.f32 %v590_v32 }
 0x234   :  { %v323_v40 = vmul.f32 %v584_v22, %v322_v34  ;;  %350 = vst.msk [vmem:[%s757_s3] sm:$0xff] %vm173_vm0, %v303_v39  ;;  %593 = vrcp.f32 %v466_v35  ;;  %vm474_vm11 = vmor %vm472_vm10, %vm473_vm8  ;;  %v493_v59 = vand.u32 2147483648, %v464_v31  ;;  %v491_v61 = vand.u32 2147483647, %v464_v31 }
 0x235   :  { %v469_v42 = vsub.f32 1.0, %v468_v38  ;;  %vm487_vm14 = vweird.f32 %v464_v31  ;;  %v523_v63 = vand.u32 2147483648, %v466_v35  ;;  %v521_v2 = vand.u32 2147483647, %v466_v35 }
 0x236   :  { %v324_v43 = vadd.f32 %v584_v22, %v323_v40  ;;  %v494_v3 = vor.u32 1.1754944e-38, %v493_v59  ;;  %vm492_vm2 = vcmp.eq.f32.partialorder %v491_v61, 8.507059e+37  ;;  %vm517_vm3 = vweird.f32 %v466_v35 }
 0x237   :  { %v470_v46 = vmul.f32 %v590_v32, %v469_v42  ;;  %v524_v7 = vor.u32 1.1754944e-38, %v523_v63  ;;  %vm522_vm5 = vcmp.eq.f32.partialorder %v521_v2, 8.507059e+37 }
 0x238   :  { %v328_v48 = vsel %vm327_vm7, %v584_v22, %v324_v43 }
 0x239   :  { %v592_v49 = vpop.eup %591  ;;  %v333_v50 = vsel %vm330_vm9, %v332_v45, %v328_v48  ;;  %v471_v51 = vadd.f32 %v590_v32, %v470_v46 }
 0x23a   :  { %352 = vst.msk [vmem:[%s757_s3 + $0x10] sm:$0xff] %vm173_vm0, %v333_v50  ;;  %v483_v53 = vmul.f32 %v592_v49, %v464_v31  ;;  %v594_v54 = vpop.eup %593  ;;  %vm488_vm13 = vweird.f32 %v592_v49 }
 0x23b   :  { %v475_v55 = vsel %vm474_vm11, %v590_v32, %v471_v51  ;;  %v513_v58 = vmul.f32 %v594_v54, %v466_v35  ;;  %vm518_vm15 = vweird.f32 %v594_v54  ;;  %vm489_vm1 = vmor %vm487_vm14, %vm488_vm13 }
 0x23c   :  { %v480_v56 = vsel %vm477_vm12, %v479_v52, %v475_v55  ;;  %v484_v57 = vsub.f32 1.0, %v483_v53  ;;  %vm519_vm4 = vmor %vm517_vm3, %vm518_vm15 }
 0x23d   :  { %556 = vst.msk [vmem:[%s757_s3 + $0x20] sm:$0xff] %vm173_vm0, %v480_v56  ;;  %v514_v62 = vsub.f32 1.0, %v513_v58 }
 0x23e   :  { %v485_v60 = vmul.f32 %v592_v49, %v484_v57 }
 0x23f   :  { %v515_v1 = vmul.f32 %v594_v54, %v514_v62 }
 0x240   :  { %v486_v0 = vadd.f32 %v592_v49, %v485_v60 }
 0x241   :  { %v516_v5 = vadd.f32 %v594_v54, %v515_v1 }
 0x242   :  { %v490_v4 = vsel %vm489_vm1, %v592_v49, %v486_v0 }
 0x243   :  { %v495_v6 = vsel %vm492_vm2, %v494_v3, %v490_v4  ;;  %v520_v8 = vsel %vm519_vm4, %v594_v54, %v516_v5 }
 0x244   :  { %557 = vst.msk [vmem:[%s757_s3 + $0x28] sm:$0xff] %vm173_vm0, %v495_v6  ;;  %v525_v9 = vsel %vm522_vm5, %v524_v7, %v520_v8 }
 0x245   :  { %559 = vst.msk [vmem:[%s757_s3 + $0x38] sm:$0xff] %vm173_vm0, %v525_v9 }

</bundles_post_ra>
